<compile_context>
chip_gen: v6e
topology: v6e:2x2x1
jax: 0.10.0
libtpu: 0.0.40
codegen_flags: <defaults>
</compile_context>

<pallas_src>
import jax
import jax.numpy as jnp
import numpy as np
from jax.experimental import pallas as pl
from jax.experimental.pallas import tpu as pltpu

_IN_FEATS = 5   # fc1 input features
_HIDDEN = 3     # fc1 output features
_LANE = 128     # vreg lane count
_SUBLANE = 8    # vreg sublane count (f32)


def _round_up(x, m):
    return ((x + m - 1) // m) * m


def _cdiv(a, b):
    return (a + b - 1) // b


def _mlp_kernel(w1_ref, b1_ref, w2_ref, b2_ref, x_ref, o_ref):
    # w1_ref: (3, 5) SMEM   fc1.weight
    # b1_ref: (3,)   SMEM   fc1.bias
    # w2_ref: (3,)   SMEM   fc2.weight (flattened)
    # b2_ref: (1,)   SMEM   fc2.bias
    # x_ref:  (TB, 5, TN) VMEM   input tile (features on sublanes, N on lanes)
    # o_ref:  (TB, TN)    VMEM   output tile (lane-dense)
    #
    # Read each feature plane straight from the ref (one strided load per
    # feature, reused across all 3 hidden units) so the sublane extraction
    # lands on vector-load slots, not VALU select chains.
    feats = [x_ref[:, c, :].astype(jnp.float32) for c in range(_IN_FEATS)]

    y = None
    for j in range(_HIDDEN):
        # h_j = relu(sum_c w1[j, c] * x_c + b1[j])          (5 FMAs / lane)
        h = feats[0] * w1_ref[j, 0]
        for c in range(1, _IN_FEATS):
            h = h + feats[c] * w1_ref[j, c]
        h = jnp.maximum(h + b1_ref[j], 0.0)
        # fc2 accumulation: y += w2[j] * h_j                 (1 FMA / lane)
        term = h * w2_ref[j]
        y = term if y is None else y + term

    o_ref[...] = jnp.maximum(y + b2_ref[0], 0.0).astype(o_ref.dtype)


def _vmem_pipeline_budget_bytes():
    """Per-step budget for all double-buffered pipeline blocks.

    Conservative 12 MiB default fits v5e's 16 MiB default scoped VMEM; scale
    up modestly (<= 24 MiB) when the chip reports more physical VMEM
    (v5e/v6e: 128 MiB, v7x: 64 MiB).
    """
    budget = 12 * 2**20
    try:
        cap = pltpu.get_tpu_info().vmem_capacity_bytes
        budget = max(budget, min(24 * 2**20, cap // 4))
    except Exception:  # best-effort query; fall back to the safe default
        pass
    return budget


def support_weight_network(x, w1, b1, w2, b2):
    """Pallas implementation of SupportWeightNetwork.forward.

    Args:
      x:  (B, 5, N) float32/bfloat16 -- same NCL layout PyTorch receives.
      w1: (3, 5)  fc1.weight
      b1: (3,)    fc1.bias
      w2: (1, 3)  fc2.weight
      b2: (1,)    fc2.bias
    Returns:
      (B, N, 1) in x.dtype
    """
    B, C, N = x.shape
    assert C == _IN_FEATS
    out_dtype = x.dtype
    in_bytes = x.dtype.itemsize
    out_bytes = jnp.dtype(out_dtype).itemsize

    # ---- VMEM budgeting: count 5->8 sublane padding + double buffering. ----
    #   input block  (TB, 5->8, TN): 8 * in_bytes * 2 buffers
    #   output block (TB, TN):       out_bytes    * 2 buffers
    per_point = 2 * (_SUBLANE * in_bytes + out_bytes)       # bytes per TB*TN point
    budget = _vmem_pipeline_budget_bytes()
    max_points = max(_SUBLANE * _LANE, budget // per_point)  # TB * TN cap

    # ---- Lane (N) tile: balanced split, multiple of 128 whenever TN < N. ---
    tn_cap = min(32768, max(_LANE, ((max_points // _SUBLANE) // _LANE) * _LANE))
    if N <= tn_cap:
        TN = N
    else:
        n_tiles = _cdiv(N, tn_cap)
        TN = _round_up(_cdiv(N, n_tiles), _LANE)

    # ---- Batch tile: multiple of 8 (or full B) under the points budget. ----
    tb_cap = max(_SUBLANE, max_points // max(TN, 1))
    TB = B if tb_cap >= B else min(B, (tb_cap // _SUBLANE) * _SUBLANE)

    # ---- Guarantee >= 2 grid steps on a parallel axis for large inputs so
    #      both v7x TensorCores get work (harmless on 1-TC v5e/v6e). ---------
    if _cdiv(B, TB) * _cdiv(N, TN) == 1 and B * N >= 65536:
        if N >= 2 * _LANE:
            TN = _round_up(_cdiv(N, 2), _LANE)
        elif B >= 2 * _SUBLANE:
            TB = _round_up(_cdiv(B, 2), _SUBLANE)

    grid = (_cdiv(B, TB), _cdiv(N, TN))

    # TODO(synk): add a small-N variant that maps B (or B*N) onto lanes when
    # N << 128, to avoid masked partial stores on the output path.

    footprint = per_point * TB * TN  # actual double-buffered block bytes
    vmem_limit = int(max(16 * 2**20, min(30 * 2**20, footprint + 4 * 2**20)))

    smem_spec = pl.BlockSpec(memory_space=pltpu.MemorySpace.SMEM)

    cost = pl.CostEstimate(
        flops=2 * (_IN_FEATS * _HIDDEN + _HIDDEN) * B * N,   # ~36 flops / point
        transcendentals=0,
        bytes_accessed=B * N * (_IN_FEATS * in_bytes + out_bytes),
    )

    out = pl.pallas_call(
        _mlp_kernel,
        out_shape=jax.ShapeDtypeStruct((B, N), out_dtype),
        grid=grid,
        in_specs=[
            smem_spec,  # w1 (3, 5)
            smem_spec,  # b1 (3,)
            smem_spec,  # w2 (3,)
            smem_spec,  # b2 (1,)
            pl.BlockSpec((TB, _IN_FEATS, TN), lambda bi, ni: (bi, 0, ni)),
        ],
        out_specs=pl.BlockSpec((TB, TN), lambda bi, ni: (bi, ni)),
        compiler_params=pltpu.CompilerParams(
            dimension_semantics=("parallel", "parallel"),
            vmem_limit_bytes=vmem_limit,
        ),
        cost_estimate=cost,
    )(
        w1.astype(jnp.float32),
        b1.astype(jnp.float32),
        w2.reshape(_HIDDEN).astype(jnp.float32),
        b2.astype(jnp.float32),
        x,   # streamed in its native dtype; cast per-tile inside the kernel
    )

    # (B, N) -> (B, N, 1); pure reshape, no data movement.
    return out.reshape(B, N, 1)


def _reference(x, w1, b1, w2, b2):
    xt = jnp.transpose(x.astype(jnp.float32), (0, 2, 1))
    h = jax.nn.relu(jnp.einsum("bnc,hc->bnh", xt, w1) + b1)
    y = jax.nn.relu(jnp.einsum("bnh,oh->bno", h, w2) + b2)
    return y


if __name__ == "__main__":
    key = jax.random.PRNGKey(0)
    kx, k1, k2, k3, k4, kx2 = jax.random.split(key, 6)

    # Deterministic parameters (shapes from nn.Linear(5, 3) / nn.Linear(3, 1)).
    w1 = jax.random.normal(k1, (3, 5), dtype=jnp.float32) * 0.5
    b1 = jax.random.normal(k2, (3,), dtype=jnp.float32) * 0.1
    w2 = jax.random.normal(k3, (1, 3), dtype=jnp.float32) * 0.5
    b2 = jax.random.normal(k4, (1,), dtype=jnp.float32) * 0.1

    # Small shape matching the module's (batch, 5, N) input.
    B, C, N = 2, 5, 8
    x = jax.random.normal(kx, (B, C, N), dtype=jnp.float32)
    out = jax.block_until_ready(support_weight_network(x, w1, b1, w2, b2))
    assert out.shape == (B, N, 1), out.shape
    ref = _reference(x, w1, b1, w2, b2)
    np.testing.assert_allclose(np.asarray(out), np.asarray(ref), rtol=1e-5, atol=1e-6)

    # Second check: large enough to exercise the >=2-step grid split and a
    # partial trailing N tile (edge masking).
    B2, N2 = 8, 8320
    x2 = jax.random.normal(kx2, (B2, C, N2), dtype=jnp.float32)
    out2 = jax.block_until_ready(support_weight_network(x2, w1, b1, w2, b2))
    ref2 = _reference(x2, w1, b1, w2, b2)
    np.testing.assert_allclose(np.asarray(out2), np.asarray(ref2), rtol=1e-5, atol=1e-6)

    print("KERNEL_OK")
</pallas_src>

<mosaic_0001>
module attributes {stable_mosaic.version = 11 : i64} {
  func.func @_mlp_kernel(%arg0: i32, %arg1: i32, %arg2: memref<3x5xf32, #tpu.memory_space<smem>>, %arg3: memref<3xf32, #tpu.memory_space<smem>>, %arg4: memref<3xf32, #tpu.memory_space<smem>>, %arg5: memref<1xf32, #tpu.memory_space<smem>>, %arg6: memref<2x5x8xf32, #tpu.memory_space<vmem>>, %arg7: memref<2x8xf32, #tpu.memory_space<vmem>>) attributes {dimension_semantics = [#tpu.dimension_semantics<parallel>, #tpu.dimension_semantics<parallel>], iteration_bounds = array<i64: 1, 1>, scalar_prefetch = 0 : i64, scratch_operands = 0 : i64, tpu.core_type = #tpu.core_type<tc>, window_params = [{transform_indices = @transform_0, window_bounds = array<i64: 3, 5>}, {transform_indices = @transform_1, window_bounds = array<i64: 3>}, {transform_indices = @transform_2, window_bounds = array<i64: 3>}, {transform_indices = @transform_3, window_bounds = array<i64: 1>}, {transform_indices = @transform_4, window_bounds = array<i64: 2, 5, 8>}, {transform_indices = @transform_5, window_bounds = array<i64: 2, 8>}]} {
    %c0 = arith.constant 0 : index
    %c0_0 = arith.constant 0 : index
    %c0_1 = arith.constant 0 : index
    %0 = vector.load %arg6[%c0, %c0_0, %c0_1] : memref<2x5x8xf32, #tpu.memory_space<vmem>>, vector<2x1x8xf32>
    %1 = vector.shape_cast %0 : vector<2x1x8xf32> to vector<2x8xf32>
    %c0_2 = arith.constant 0 : index
    %c1 = arith.constant 1 : index
    %c0_3 = arith.constant 0 : index
    %2 = vector.load %arg6[%c0_2, %c1, %c0_3] : memref<2x5x8xf32, #tpu.memory_space<vmem>>, vector<2x1x8xf32>
    %3 = vector.shape_cast %2 : vector<2x1x8xf32> to vector<2x8xf32>
    %c0_4 = arith.constant 0 : index
    %c2 = arith.constant 2 : index
    %c0_5 = arith.constant 0 : index
    %4 = vector.load %arg6[%c0_4, %c2, %c0_5] : memref<2x5x8xf32, #tpu.memory_space<vmem>>, vector<2x1x8xf32>
    %5 = vector.shape_cast %4 : vector<2x1x8xf32> to vector<2x8xf32>
    %c0_6 = arith.constant 0 : index
    %c3 = arith.constant 3 : index
    %c0_7 = arith.constant 0 : index
    %6 = vector.load %arg6[%c0_6, %c3, %c0_7] : memref<2x5x8xf32, #tpu.memory_space<vmem>>, vector<2x1x8xf32>
    %7 = vector.shape_cast %6 : vector<2x1x8xf32> to vector<2x8xf32>
    %c0_8 = arith.constant 0 : index
    %c4 = arith.constant 4 : index
    %c0_9 = arith.constant 0 : index
    %8 = vector.load %arg6[%c0_8, %c4, %c0_9] : memref<2x5x8xf32, #tpu.memory_space<vmem>>, vector<2x1x8xf32>
    %9 = vector.shape_cast %8 : vector<2x1x8xf32> to vector<2x8xf32>
    %c0_10 = arith.constant 0 : index
    %c0_11 = arith.constant 0 : index
    %10 = memref.load %arg2[%c0_10, %c0_11] : memref<3x5xf32, #tpu.memory_space<smem>>
    %11 = vector.broadcast %10 : f32 to vector<2x8xf32>
    %12 = arith.mulf %1, %11 : vector<2x8xf32>
    %c0_12 = arith.constant 0 : index
    %c1_13 = arith.constant 1 : index
    %13 = memref.load %arg2[%c0_12, %c1_13] : memref<3x5xf32, #tpu.memory_space<smem>>
    %14 = vector.broadcast %13 : f32 to vector<2x8xf32>
    %15 = arith.mulf %3, %14 : vector<2x8xf32>
    %16 = arith.addf %12, %15 : vector<2x8xf32>
    %c0_14 = arith.constant 0 : index
    %c2_15 = arith.constant 2 : index
    %17 = memref.load %arg2[%c0_14, %c2_15] : memref<3x5xf32, #tpu.memory_space<smem>>
    %18 = vector.broadcast %17 : f32 to vector<2x8xf32>
    %19 = arith.mulf %5, %18 : vector<2x8xf32>
    %20 = arith.addf %16, %19 : vector<2x8xf32>
    %c0_16 = arith.constant 0 : index
    %c3_17 = arith.constant 3 : index
    %21 = memref.load %arg2[%c0_16, %c3_17] : memref<3x5xf32, #tpu.memory_space<smem>>
    %22 = vector.broadcast %21 : f32 to vector<2x8xf32>
    %23 = arith.mulf %7, %22 : vector<2x8xf32>
    %24 = arith.addf %20, %23 : vector<2x8xf32>
    %c0_18 = arith.constant 0 : index
    %c4_19 = arith.constant 4 : index
    %25 = memref.load %arg2[%c0_18, %c4_19] : memref<3x5xf32, #tpu.memory_space<smem>>
    %26 = vector.broadcast %25 : f32 to vector<2x8xf32>
    %27 = arith.mulf %9, %26 : vector<2x8xf32>
    %28 = arith.addf %24, %27 : vector<2x8xf32>
    %c0_20 = arith.constant 0 : index
    %29 = memref.load %arg3[%c0_20] : memref<3xf32, #tpu.memory_space<smem>>
    %30 = vector.broadcast %29 : f32 to vector<2x8xf32>
    %31 = arith.addf %28, %30 : vector<2x8xf32>
    %cst = arith.constant 0.000000e+00 : f32
    %32 = vector.broadcast %cst : f32 to vector<2x8xf32>
    %33 = arith.maximumf %31, %32 : vector<2x8xf32>
    %c0_21 = arith.constant 0 : index
    %34 = memref.load %arg4[%c0_21] : memref<3xf32, #tpu.memory_space<smem>>
    %35 = vector.broadcast %34 : f32 to vector<2x8xf32>
    %36 = arith.mulf %33, %35 : vector<2x8xf32>
    %c1_22 = arith.constant 1 : index
    %c0_23 = arith.constant 0 : index
    %37 = memref.load %arg2[%c1_22, %c0_23] : memref<3x5xf32, #tpu.memory_space<smem>>
    %38 = vector.broadcast %37 : f32 to vector<2x8xf32>
    %39 = arith.mulf %1, %38 : vector<2x8xf32>
    %c1_24 = arith.constant 1 : index
    %c1_25 = arith.constant 1 : index
    %40 = memref.load %arg2[%c1_24, %c1_25] : memref<3x5xf32, #tpu.memory_space<smem>>
    %41 = vector.broadcast %40 : f32 to vector<2x8xf32>
    %42 = arith.mulf %3, %41 : vector<2x8xf32>
    %43 = arith.addf %39, %42 : vector<2x8xf32>
    %c1_26 = arith.constant 1 : index
    %c2_27 = arith.constant 2 : index
    %44 = memref.load %arg2[%c1_26, %c2_27] : memref<3x5xf32, #tpu.memory_space<smem>>
    %45 = vector.broadcast %44 : f32 to vector<2x8xf32>
    %46 = arith.mulf %5, %45 : vector<2x8xf32>
    %47 = arith.addf %43, %46 : vector<2x8xf32>
    %c1_28 = arith.constant 1 : index
    %c3_29 = arith.constant 3 : index
    %48 = memref.load %arg2[%c1_28, %c3_29] : memref<3x5xf32, #tpu.memory_space<smem>>
    %49 = vector.broadcast %48 : f32 to vector<2x8xf32>
    %50 = arith.mulf %7, %49 : vector<2x8xf32>
    %51 = arith.addf %47, %50 : vector<2x8xf32>
    %c1_30 = arith.constant 1 : index
    %c4_31 = arith.constant 4 : index
    %52 = memref.load %arg2[%c1_30, %c4_31] : memref<3x5xf32, #tpu.memory_space<smem>>
    %53 = vector.broadcast %52 : f32 to vector<2x8xf32>
    %54 = arith.mulf %9, %53 : vector<2x8xf32>
    %55 = arith.addf %51, %54 : vector<2x8xf32>
    %c1_32 = arith.constant 1 : index
    %56 = memref.load %arg3[%c1_32] : memref<3xf32, #tpu.memory_space<smem>>
    %57 = vector.broadcast %56 : f32 to vector<2x8xf32>
    %58 = arith.addf %55, %57 : vector<2x8xf32>
    %cst_33 = arith.constant 0.000000e+00 : f32
    %59 = vector.broadcast %cst_33 : f32 to vector<2x8xf32>
    %60 = arith.maximumf %58, %59 : vector<2x8xf32>
    %c1_34 = arith.constant 1 : index
    %61 = memref.load %arg4[%c1_34] : memref<3xf32, #tpu.memory_space<smem>>
    %62 = vector.broadcast %61 : f32 to vector<2x8xf32>
    %63 = arith.mulf %60, %62 : vector<2x8xf32>
    %64 = arith.addf %36, %63 : vector<2x8xf32>
    %c2_35 = arith.constant 2 : index
    %c0_36 = arith.constant 0 : index
    %65 = memref.load %arg2[%c2_35, %c0_36] : memref<3x5xf32, #tpu.memory_space<smem>>
    %66 = vector.broadcast %65 : f32 to vector<2x8xf32>
    %67 = arith.mulf %1, %66 : vector<2x8xf32>
    %c2_37 = arith.constant 2 : index
    %c1_38 = arith.constant 1 : index
    %68 = memref.load %arg2[%c2_37, %c1_38] : memref<3x5xf32, #tpu.memory_space<smem>>
    %69 = vector.broadcast %68 : f32 to vector<2x8xf32>
    %70 = arith.mulf %3, %69 : vector<2x8xf32>
    %71 = arith.addf %67, %70 : vector<2x8xf32>
    %c2_39 = arith.constant 2 : index
    %c2_40 = arith.constant 2 : index
    %72 = memref.load %arg2[%c2_39, %c2_40] : memref<3x5xf32, #tpu.memory_space<smem>>
    %73 = vector.broadcast %72 : f32 to vector<2x8xf32>
    %74 = arith.mulf %5, %73 : vector<2x8xf32>
    %75 = arith.addf %71, %74 : vector<2x8xf32>
    %c2_41 = arith.constant 2 : index
    %c3_42 = arith.constant 3 : index
    %76 = memref.load %arg2[%c2_41, %c3_42] : memref<3x5xf32, #tpu.memory_space<smem>>
    %77 = vector.broadcast %76 : f32 to vector<2x8xf32>
    %78 = arith.mulf %7, %77 : vector<2x8xf32>
    %79 = arith.addf %75, %78 : vector<2x8xf32>
    %c2_43 = arith.constant 2 : index
    %c4_44 = arith.constant 4 : index
    %80 = memref.load %arg2[%c2_43, %c4_44] : memref<3x5xf32, #tpu.memory_space<smem>>
    %81 = vector.broadcast %80 : f32 to vector<2x8xf32>
    %82 = arith.mulf %9, %81 : vector<2x8xf32>
    %83 = arith.addf %79, %82 : vector<2x8xf32>
    %c2_45 = arith.constant 2 : index
    %84 = memref.load %arg3[%c2_45] : memref<3xf32, #tpu.memory_space<smem>>
    %85 = vector.broadcast %84 : f32 to vector<2x8xf32>
    %86 = arith.addf %83, %85 : vector<2x8xf32>
    %cst_46 = arith.constant 0.000000e+00 : f32
    %87 = vector.broadcast %cst_46 : f32 to vector<2x8xf32>
    %88 = arith.maximumf %86, %87 : vector<2x8xf32>
    %c2_47 = arith.constant 2 : index
    %89 = memref.load %arg4[%c2_47] : memref<3xf32, #tpu.memory_space<smem>>
    %90 = vector.broadcast %89 : f32 to vector<2x8xf32>
    %91 = arith.mulf %88, %90 : vector<2x8xf32>
    %92 = arith.addf %64, %91 : vector<2x8xf32>
    %c0_48 = arith.constant 0 : index
    %93 = memref.load %arg5[%c0_48] : memref<1xf32, #tpu.memory_space<smem>>
    %94 = vector.broadcast %93 : f32 to vector<2x8xf32>
    %95 = arith.addf %92, %94 : vector<2x8xf32>
    %cst_49 = arith.constant 0.000000e+00 : f32
    %96 = vector.broadcast %cst_49 : f32 to vector<2x8xf32>
    %97 = arith.maximumf %95, %96 : vector<2x8xf32>
    %c0_50 = arith.constant 0 : index
    %c0_51 = arith.constant 0 : index
    %98 = vector.load %arg7[%c0_50, %c0_51] : memref<2x8xf32, #tpu.memory_space<vmem>>, vector<2x8xf32>
    tpu.vector_store %arg7[%c0_50, %c0_51], %97 {strides = array<i32>} : memref<2x8xf32, #tpu.memory_space<vmem>>, vector<2x8xf32>,
    return
  }
  func.func @transform_0(%arg0: i32, %arg1: i32) -> (i32, i32) {
    %c0_i32 = arith.constant 0 : i32
    %c0_i32_0 = arith.constant 0 : i32
    %c0_i32_1 = arith.constant 0 : i32
    return %c0_i32, %c0_i32_0 : i32, i32
  }
  func.func @transform_1(%arg0: i32, %arg1: i32) -> i32 {
    %c0_i32 = arith.constant 0 : i32
    %c0_i32_0 = arith.constant 0 : i32
    return %c0_i32 : i32
  }
  func.func @transform_2(%arg0: i32, %arg1: i32) -> i32 {
    %c0_i32 = arith.constant 0 : i32
    %c0_i32_0 = arith.constant 0 : i32
    return %c0_i32 : i32
  }
  func.func @transform_3(%arg0: i32, %arg1: i32) -> i32 {
    %c0_i32 = arith.constant 0 : i32
    %c0_i32_0 = arith.constant 0 : i32
    return %c0_i32 : i32
  }
  func.func @transform_4(%arg0: i32, %arg1: i32) -> (i32, i32, i32) {
    %c0_i32 = arith.constant 0 : i32
    %c0_i32_0 = arith.constant 0 : i32
    return %arg0, %c0_i32, %arg1 : i32, i32, i32
  }
  func.func @transform_5(%arg0: i32, %arg1: i32) -> (i32, i32) {
    %c0_i32 = arith.constant 0 : i32
    return %arg0, %arg1 : i32, i32
  }
}

</mosaic_0001>

<bundles_post_ra>
// kernel: tpu_custom_call.1
= control target key start
LH: loop header
LB: loop body
LE: loop exit
PB: predicated region body
PF: predicated region fallthrough
CT: control target
= control target key end

     0   :  { %11 = vsyncpa [#allocation5], 0  ;;  %s471_s0 = inlined_call_operand.vmem [shape: f32[3,5], index: 0, kind: input, shape index: {}]   ;;  %s472_s1 = inlined_call_operand.vmem [shape: f32[3], index: 1, kind: input, shape index: {}]   ;;  %s473_s2 = inlined_call_operand.vmem [shape: f32[3], index: 2, kind: input, shape index: {}]   ;;  %s474_s3 = inlined_call_operand.<no memory space> [shape: f32[1], index: 3, kind: input, shape index: {}]   ;;  %s475_s4 = inlined_call_operand.vmem [shape: f32[2,5,8], index: 4, kind: input, shape index: {}]   ;;  %s476_s5 = inlined_call_operand.hbm [shape: f32[2,8], index: 5, kind: output, shape index: {}]  }
   0x1   :  { %12 = vsyncpa [#allocation7], 0  ;;  %s30_s20 = sshll.u32 %s472_s1, 4  ;;  %s31_s20 = int_to_ptr.vmem [resolvable:$true] %s30_s20 }
   0x2   :  { %13 = vsyncpa [#allocation4], 0  ;;  %s20_s23 = sshll.u32 %s471_s0, 4  ;;  %s238_s24 = scalar_lea.vmem %s31_s20, 16  ;;  %s21_s23 = int_to_ptr.vmem [resolvable:$true] %s20_s23 }
   0x3   :  { %p239_p0 = scmp.ne.s32.totalorder %s31_s20, %s238_s24  ;;  %p243_p1 = scmp.lt.s32.totalorder %s31_s20, %s31_s20 }
   0x4   :  { %p244_p2 = scmp.lt.s32.totalorder %s238_s24, %s238_s24 }
   0x6   :  { %p245_p3 = por %p244_p2, %p243_p1 }
   0x8   :  { %p246_p4 = pnand %p245_p3, %p239_p0 }
   0xa   :  { %249 = shalt.err (!%p246_p4)
}
   0xb   :  { %s300_s25 = smov [#allocation6]   ;;  %s250_s26 = scalar_lea.vmem %s21_s23, 64 }
   0xc   :  { %33 = dma.vmem_to_smem %s31_s20, 16, %s300_s25, [#allocation7]  }
   0xd   :  { %p251_p5 = scmp.ne.s32.totalorder %s21_s23, %s250_s26  ;;  %p255_p6 = scmp.lt.s32.totalorder %s21_s23, %s21_s23 }
   0xe   :  { %p256_p7 = scmp.lt.s32.totalorder %s250_s26, %s250_s26 }
  0x10   :  { %p257_p8 = por %p256_p7, %p255_p6 }
  0x12   :  { %p258_p9 = pnand %p257_p8, %p251_p5 }
  0x14   :  { %261 = shalt.err (!%p258_p9)
}
  0x15   :  { %s301_s1 = smov [#allocation3]   ;;  %s40_s28 = sshll.u32 %s473_s2, 4  ;;  %s41_s28 = int_to_ptr.vmem [resolvable:$true] %s40_s28 }
  0x16   :  { %23 = dma.vmem_to_smem %s21_s23, 64, %s301_s1, [#allocation5]  }
  0x17   :  { %s262_s29 = scalar_lea.vmem %s41_s28, 16  ;;  %p267_p11 = scmp.lt.s32.totalorder %s41_s28, %s41_s28 }
  0x18   :  { %p263_p10 = scmp.ne.s32.totalorder %s41_s28, %s262_s29  ;;  %p268_p12 = scmp.lt.s32.totalorder %s262_s29, %s262_s29 }
  0x1a   :  { %p269_p13 = por %p268_p12, %p267_p11 }
  0x1c   :  { %p270_p0 = pnand %p269_p13, %p263_p10 }
  0x1e   :  { %273 = shalt.err (!%p270_p0)
}
  0x1f   :  { %s302_s30 = smov [#allocation8]  }
  0x20   :  { %43 = dma.vmem_to_smem %s41_s28, 16, %s302_s30, [#allocation7]  }
  0x21   :  { %294 = dma.done.wait [#allocation5], 64  }
  0x22   :  { %295 = vsyncadd [#allocation5], 4294967232 }
  0x23   :  { %296 = dma.done.wait [#allocation7], 32  }
  0x24   :  { %297 = vsyncadd [#allocation7], 4294967264 }
  0x25   :  { %57 = sfence }
  0x26   :  { %s68_s6 = sld [smem:[#allocation3]]  ;;  %v346_v0 = vld [vmem:[%s475_s4] sm:$0x1]  ;;  %v351_v1 = vld [vmem:[%s475_s4 + $0x8] sm:$0x1]  ;;  %s303_s19 = smov [#allocation9]  }
  0x27   :  { %s216_s7 = sld [smem:[#allocation3 + $0x1]]  ;;  %v358_v2 = vld [vmem:[%s475_s4 + $0x1] sm:$0x1]  ;;  %v363_v3 = vld [vmem:[%s475_s4 + $0x9] sm:$0x1]  ;;  %s206_s20 = sshll.u32 %s303_s19, 4  ;;  %s207_s20 = int_to_ptr.vmem [resolvable:$true] %s206_s20 }
  0x28   :  { %s217_s8 = sld [smem:[#allocation3 + $0x2]]  ;;  %v368_v4 = vld [vmem:[%s475_s4 + $0x2] sm:$0x1]  ;;  %v373_v5 = vld [vmem:[%s475_s4 + $0xa] sm:$0x1]  ;;  %vm195_vm0 = vcmask 1041409   ;;  %p279_p2 = scmp.lt.s32.totalorder %s207_s20, %s207_s20 }
  0x29   :  { %s218_s9 = sld [smem:[#allocation3 + $0x3]]  ;;  %v380_v7 = vld [vmem:[%s475_s4 + $0x3] sm:$0x1]  ;;  %v385_v8 = vld [vmem:[%s475_s4 + $0xb] sm:$0x1]  ;;  %vm198_vm1 = vcmask 58368  }
  0x2a   :  { %s353_s13 = sld [smem:[#allocation3 + $0x4]]  ;;  %v396_v15 = vld [vmem:[%s475_s4 + $0x4] sm:$0x1]  ;;  %v401_v16 = vld [vmem:[%s475_s4 + $0xc] sm:$0x1]  ;;  %s274_s21 = scalar_lea.vmem %s207_s20, 32 }
  0x2b   :  { %s375_s22 = sld [smem:[#allocation6]]  ;;  %p275_p1 = scmp.ne.s32.totalorder %s207_s20, %s274_s21 }
  0x2c   :  { %v69_v6 = vstv %s68_s6  ;;  %s220_s1 = sld [smem:[#allocation3 + $0x80]]  ;;  %p280_p3 = scmp.lt.s32.totalorder %s274_s21, %s274_s21 }
  0x2d   :  { %v70_v9 = vmul.f32 %v69_v6, %v346_v0  ;;  %v71_v10 = vmul.f32 %v69_v6, %v351_v1  ;;  %v73_v11 = vstv %s216_s7  ;;  %s391_s0 = sld [smem:[#allocation3 + $0x81]] }
  0x2e   :  { %v74_v12 = vmul.f32 %v73_v11, %v358_v2  ;;  %v75_v13 = vmul.f32 %v73_v11, %v363_v3  ;;  %v79_v14 = vstv %s217_s8  ;;  %s222_s6 = sld [smem:[#allocation3 + $0x82]]  ;;  %p281_p4 = por %p280_p3, %p279_p2 }
  0x2f   :  { %v80_v17 = vmul.f32 %v79_v14, %v368_v4  ;;  %v81_v18 = vmul.f32 %v79_v14, %v373_v5  ;;  %v85_v19 = vstv %s218_s9  ;;  %s407_s7 = sld [smem:[#allocation3 + $0x83]] }
  0x30   :  { %v76_v20 = vadd.f32 %v74_v12, %v70_v9  ;;  %v77_v21 = vadd.f32 %v75_v13, %v71_v10  ;;  %v86_v22 = vmul.f32 %v85_v19, %v380_v7  ;;  %v87_v23 = vmul.f32 %v85_v19, %v385_v8  ;;  %s410_s8 = sld [smem:[#allocation3 + $0x84]]  ;;  %p282_p5 = pnand %p281_p4, %p275_p1 }
  0x31   :  { %v91_v24 = vstv %s353_s13  ;;  %s414_s4 = sld [smem:[#allocation8]]  ;;  %v97_v34 = vstv %s375_s22 }
  0x32   :  { %v82_v25 = vadd.f32 %v80_v17, %v76_v20  ;;  %v83_v26 = vadd.f32 %v81_v18, %v77_v21  ;;  %v92_v27 = vmul.f32 %v91_v24, %v396_v15  ;;  %v93_v28 = vmul.f32 %v91_v24, %v401_v16  ;;  %s416_s9 = sld [smem:[#allocation6 + $0x1]] }
  0x33   :  { %v107_v29 = vstv %s220_s1  ;;  %s420_s2 = sld [smem:[#allocation3 + $0x100]]  ;;  %v111_v35 = vstv %s391_s0 }
  0x34   :  { %v88_v30 = vadd.f32 %v86_v22, %v82_v25  ;;  %v89_v31 = vadd.f32 %v87_v23, %v83_v26  ;;  %v108_v32 = vmul.f32 %v107_v29, %v346_v0  ;;  %v109_v33 = vmul.f32 %v107_v29, %v351_v1  ;;  %s424_s10 = sld [smem:[#allocation3 + $0x101]] }
  0x35   :  { %v117_v36 = vstv %s222_s6  ;;  %v112_v39 = vmul.f32 %v111_v35, %v358_v2  ;;  %v113_v40 = vmul.f32 %v111_v35, %v363_v3  ;;  %s428_s11 = sld [smem:[#allocation3 + $0x102]]  ;;  %v123_v43 = vstv %s407_s7 }
  0x36   :  { %v94_v37 = vadd.f32 %v92_v27, %v88_v30  ;;  %v95_v38 = vadd.f32 %v93_v28, %v89_v31  ;;  %v118_v41 = vmul.f32 %v117_v36, %v368_v4  ;;  %v119_v42 = vmul.f32 %v117_v36, %v373_v5  ;;  %s434_s12 = sld [smem:[#allocation3 + $0x103]] }
  0x37   :  { %v129_v44 = vstv %s410_s8  ;;  %v114_v47 = vadd.f32 %v112_v39, %v108_v32  ;;  %v115_v48 = vadd.f32 %v113_v40, %v109_v33  ;;  %s436_s13 = sld [smem:[#allocation8 + $0x1]]  ;;  %v124_v49 = vmul.f32 %v123_v43, %v380_v7 }
  0x38   :  { %v98_v45 = vadd.f32 %v97_v34, %v94_v37  ;;  %v99_v46 = vadd.f32 %v97_v34, %v95_v38  ;;  %v125_v50 = vmul.f32 %v123_v43, %v385_v8  ;;  %s440_s14 = sld [smem:[#allocation3 + $0x104]]  ;;  %v130_v53 = vmul.f32 %v129_v44, %v396_v15 }
  0x39   :  { %v120_v51 = vadd.f32 %v118_v41, %v114_v47  ;;  %v121_v52 = vadd.f32 %v119_v42, %v115_v48  ;;  %v131_v54 = vmul.f32 %v129_v44, %v401_v16  ;;  %v103_v56 = vstv %s414_s4  ;;  %s448_s15 = sld [smem:[#allocation6 + $0x2]] }
  0x3a   :  { %v100_v55 = vmax.f32 %v98_v45, 0.0  ;;  %v147_v57 = vstv %s420_s2  ;;  %v151_v58 = vstv %s424_s10  ;;  %v101_v59 = vmax.f32 %v99_v46, 0.0  ;;  %s233_s16 = sld [smem:[#allocation8 + $0x2]] }
  0x3b   :  { %v126_v60 = vadd.f32 %v124_v49, %v120_v51  ;;  %v127_v61 = vadd.f32 %v125_v50, %v121_v52  ;;  %v135_v62 = vstv %s416_s9  ;;  %v148_v63 = vmul.f32 %v147_v57, %v346_v0 }
  0x3c   :  { %v149_v6 = vmul.f32 %v147_v57, %v351_v1  ;;  %v152_v9 = vmul.f32 %v151_v58, %v358_v2  ;;  %v153_v10 = vmul.f32 %v151_v58, %v363_v3  ;;  %v157_v13 = vstv %s428_s11 }
  0x3d   :  { %v132_v11 = vadd.f32 %v130_v53, %v126_v60  ;;  %v133_v12 = vadd.f32 %v131_v54, %v127_v61  ;;  %v163_v14 = vstv %s434_s12  ;;  %v158_v19 = vmul.f32 %v157_v13, %v368_v4 }
  0x3e   :  { %v154_v17 = vadd.f32 %v152_v9, %v148_v63  ;;  %v155_v18 = vadd.f32 %v153_v10, %v149_v6  ;;  %v159_v20 = vmul.f32 %v157_v13, %v373_v5  ;;  %v164_v1 = vmul.f32 %v163_v14, %v380_v7 }
  0x3f   :  { %v136_v21 = vadd.f32 %v135_v62, %v132_v11  ;;  %v137_v0 = vadd.f32 %v135_v62, %v133_v12  ;;  %v165_v2 = vmul.f32 %v163_v14, %v385_v8  ;;  %v141_v3 = vstv %s436_s13 }
  0x40   :  { %v160_v22 = vadd.f32 %v158_v19, %v154_v17  ;;  %v161_v23 = vadd.f32 %v159_v20, %v155_v18  ;;  %v169_v24 = vstv %s440_s14  ;;  %v104_v29 = vmul.f32 %v103_v56, %v100_v55 }
  0x41   :  { %v138_v25 = vmax.f32 %v136_v21, 0.0  ;;  %v139_v26 = vmax.f32 %v137_v0, 0.0  ;;  %v170_v27 = vmul.f32 %v169_v24, %v396_v15  ;;  %v171_v4 = vmul.f32 %v169_v24, %v401_v16 }
  0x42   :  { %v166_v28 = vadd.f32 %v164_v1, %v160_v22  ;;  %v167_v5 = vadd.f32 %v165_v2, %v161_v23  ;;  %v105_v30 = vmul.f32 %v103_v56, %v101_v59  ;;  %v175_v31 = vstv %s448_s15 }
  0x43   :  { %v142_v32 = vmul.f32 %v141_v3, %v138_v25  ;;  %v143_v7 = vmul.f32 %v141_v3, %v139_v26  ;;  %v181_v36 = vstv %s233_s16  ;;  %v187_v16 = vstv %s474_s3 }
  0x44   :  { %v172_v33 = vadd.f32 %v170_v27, %v166_v28  ;;  %v173_v8 = vadd.f32 %v171_v4, %v167_v5 }
  0x45   :  { %v144_v37 = vadd.f32 %v142_v32, %v104_v29  ;;  %v145_v38 = vadd.f32 %v143_v7, %v105_v30 }
  0x46   :  { %v176_v34 = vadd.f32 %v175_v31, %v172_v33  ;;  %v177_v35 = vadd.f32 %v175_v31, %v173_v8 }
  0x48   :  { %v178_v39 = vmax.f32 %v176_v34, 0.0  ;;  %v179_v40 = vmax.f32 %v177_v35, 0.0 }
  0x4a   :  { %v182_v41 = vmul.f32 %v181_v36, %v178_v39  ;;  %v183_v15 = vmul.f32 %v181_v36, %v179_v40 }
  0x4c   :  { %v184_v42 = vadd.f32 %v182_v41, %v144_v37  ;;  %v185_v43 = vadd.f32 %v183_v15, %v145_v38 }
  0x4e   :  { %v188_v44 = vadd.f32 %v187_v16, %v184_v42  ;;  %v189_v45 = vadd.f32 %v187_v16, %v185_v43 }
  0x50   :  { %v190_v46 = vmax.f32 %v188_v44, 0.0  ;;  %v191_v47 = vmax.f32 %v189_v45, 0.0 }
  0x52   :  { %v194_v48 = vrot.slane %v191_v47, 7 }
  0x54   :  { %v196_v49 = vsel %vm195_vm0, %v194_v48, %v190_v46 }
  0x55   :  { %199 = vst.msk [vmem:[#allocation9] sm:$0x3] %vm198_vm1, %v196_v49 }
  0x56   :  { %285 = shalt.err (!%p282_p5)
}
  0x57   :  { %209 = dma.vmem_to_hbm [thread:$0]  %s207_s20, 32, %s476_s5, [#allocation4]  }
  0x58   :  { %298 = dma.done.wait [#allocation4], 32  }
  0x59   :  { %299 = vsyncadd [#allocation4], 4294967264 }
  0x5a   :  { %213 = vsyncpa [#allocation4], 1 }
  0x5b   :  { %214 = vsyncpa [#allocation5], 1 }
  0x5c   :  { %215 = vsyncpa [#allocation7], 1 }

</bundles_post_ra>
